<compile_context>
chip_gen: v7x
topology: tpu7x:2x2x1
jax: 0.10.0
libtpu: 0.0.40
codegen_flags: <defaults>
</compile_context>

<pallas_src>
import functools
import math

import jax
import jax.numpy as jnp
from jax.experimental import pallas as pl
from jax.experimental.pallas import tpu as pltpu


def _round_up(n, m):
    return ((n + m - 1) // m) * m


def _sinusoidal_pos_emb_kernel(x_ref, out_ref, *, half_dim, neg_log_scale):
    """x_ref: [tb, 1] f32 timesteps; out_ref: [tb, 2*half_dim] embedding."""
    tb, out_dim = out_ref.shape
    x_col = x_ref[...].astype(jnp.float32)                         # [tb, 1]

    if half_dim % 128 == 0:
        # Both halves are 128-lane aligned: compute the angle tile once at
        # (tb, half_dim) and do two unmasked stores (no select, no phase add).
        k = jax.lax.broadcasted_iota(jnp.float32, (1, half_dim), 1)
        freqs = jnp.exp(k * neg_log_scale)                          # (1, half_dim)
        ang = x_col * freqs                                         # (tb, half_dim)
        out_ref[:, :half_dim] = jnp.sin(ang).astype(out_ref.dtype)
        out_ref[:, half_dim:] = jnp.cos(ang).astype(out_ref.dtype)
    else:
        # General case: fold [sin | cos] halves into one full-width sin pass
        # using cos(a) = sin(a + pi/2). All lane-only vectors are (1, out_dim)
        # and broadcast against the (tb, 1) timestep column.
        idx = jax.lax.broadcasted_iota(jnp.int32, (1, out_dim), 1)
        in_sin_half = idx < half_dim
        k = jnp.where(in_sin_half, idx, idx - half_dim).astype(jnp.float32)
        freqs = jnp.exp(k * neg_log_scale)                          # (1, out_dim)
        phase = jnp.where(in_sin_half,
                          jnp.float32(0.0),
                          jnp.float32(math.pi / 2.0))               # (1, out_dim)
        ang = x_col * freqs + phase                                 # (tb, out_dim)
        out_ref[...] = jnp.sin(ang).astype(out_ref.dtype)


def sinusoidal_pos_emb(x, dim, *, max_block_b=1024, out_dtype=jnp.float32):
    """x: [B] (timesteps) -> [B, 2*(dim//2)], matching torch SinusoidalPosEmb."""
    B = x.shape[0]
    half_dim = dim // 2
    out_dim = 2 * half_dim
    # Note: dim == 2 divides by zero here, exactly like the torch module.
    neg_log_scale = -(math.log(10000.0) / (half_dim - 1))

    # Batch tile: multiple of 8 (sublane rule), capped at max_block_b, and
    # sized so the grid has >= 2 steps whenever B > 8 (v7x 2-core sharding).
    tb = min(max_block_b, max(8, _round_up(pl.cdiv(B, 2), 8)))
    grid = (pl.cdiv(B, tb),)

    x2 = x.astype(jnp.float32).reshape(B, 1)

    kernel = functools.partial(_sinusoidal_pos_emb_kernel,
                               half_dim=half_dim,
                               neg_log_scale=neg_log_scale)

    out = pl.pallas_call(
        kernel,
        out_shape=jax.ShapeDtypeStruct((B, out_dim), out_dtype),
        grid=grid,
        in_specs=[pl.BlockSpec((tb, 1), lambda i: (i, 0))],
        out_specs=pl.BlockSpec((tb, out_dim), lambda i: (i, 0)),
        compiler_params=pltpu.CompilerParams(
            dimension_semantics=("parallel",)),
    )(x2)
    return out


# ---------------------- pure-JAX reference (for checking) -----------------
def ref_forward(x, dim):
    half_dim = dim // 2
    scale = math.log(10000.0) / (half_dim - 1)
    freqs = jnp.exp(jnp.arange(half_dim, dtype=jnp.float32) * -scale)
    emb = x.astype(jnp.float32)[:, None] * freqs[None, :]
    return jnp.concatenate([jnp.sin(emb), jnp.cos(emb)], axis=-1)


if __name__ == "__main__":
    key = jax.random.PRNGKey(0)
    k1, k2, k3 = jax.random.split(key, 3)

    # Small shape consistent with the module: batch=2, dim=32 (phase path).
    B, dim = 2, 32
    x = jax.random.uniform(k1, (B,), jnp.float32, 0.0, 10.0)
    out = jax.block_until_ready(sinusoidal_pos_emb(x, dim))
    ref = ref_forward(x, dim)
    assert out.shape == (B, dim)
    err = float(jnp.max(jnp.abs(out - ref)))
    assert jnp.allclose(out, ref, atol=1e-4, rtol=1e-4), f"max abs err {err}"

    # Multi-step grid + ragged last block, dim=128 (phase path, lane-dense).
    B2, dim2 = 300, 128
    x2 = jax.random.uniform(k2, (B2,), jnp.float32, 0.0, 10.0)
    out2 = jax.block_until_ready(sinusoidal_pos_emb(x2, dim2))
    ref2 = ref_forward(x2, dim2)
    assert out2.shape == (B2, dim2)
    err2 = float(jnp.max(jnp.abs(out2 - ref2)))
    assert jnp.allclose(out2, ref2, atol=1e-4, rtol=1e-4), f"max abs err {err2}"

    # half_dim % 128 == 0 path (two unmasked 128-lane-aligned stores).
    B3, dim3 = 40, 256
    x3 = jax.random.uniform(k3, (B3,), jnp.float32, 0.0, 10.0)
    out3 = jax.block_until_ready(sinusoidal_pos_emb(x3, dim3))
    ref3 = ref_forward(x3, dim3)
    assert out3.shape == (B3, dim3)
    err3 = float(jnp.max(jnp.abs(out3 - ref3)))
    assert jnp.allclose(out3, ref3, atol=1e-4, rtol=1e-4), f"max abs err {err3}"

    print("KERNEL_OK")
</pallas_src>

<mosaic_0001>
module attributes {stable_mosaic.version = 11 : i64} {
  func.func @_sinusoidal_pos_emb_kernel(%arg0: i32, %arg1: memref<8x1xf32, #tpu.memory_space<vmem>>, %arg2: memref<8x32xf32, #tpu.memory_space<vmem>>) attributes {dimension_semantics = [#tpu.dimension_semantics<parallel>], iteration_bounds = array<i64: 1>, scalar_prefetch = 0 : i64, scratch_operands = 0 : i64, tpu.core_type = #tpu.core_type<tc>, window_params = [{transform_indices = @transform_0, window_bounds = array<i64: 8, 1>}, {transform_indices = @transform_1, window_bounds = array<i64: 8, 32>}]} {
    %c0 = arith.constant 0 : index
    %c0_0 = arith.constant 0 : index
    %0 = vector.load %arg1[%c0, %c0_0] : memref<8x1xf32, #tpu.memory_space<vmem>>, vector<8x1xf32>
    %1 = tpu.iota {dimensions = array<i32: 1>} : vector<1x32xi32>
    %c16_i32 = arith.constant 16 : i32
    %2 = vector.broadcast %c16_i32 : i32 to vector<1x32xi32>
    %3 = arith.cmpi slt, %1, %2 : vector<1x32xi32>
    %c16_i32_1 = arith.constant 16 : i32
    %4 = vector.broadcast %c16_i32_1 : i32 to vector<1x32xi32>
    %5 = arith.subi %1, %4 : vector<1x32xi32>
    %6 = arith.select %3, %1, %5 : vector<1x32xi1>, vector<1x32xi32>
    %7 = arith.sitofp %6 : vector<1x32xi32> to vector<1x32xf32>
    %cst = arith.constant -0.614022672 : f32
    %8 = vector.broadcast %cst : f32 to vector<1x32xf32>
    %9 = arith.mulf %7, %8 : vector<1x32xf32>
    %10 = math.exp %9 : vector<1x32xf32>
    %cst_2 = arith.constant 0.000000e+00 : f32
    %cst_3 = arith.constant 1.57079637 : f32
    %11 = vector.broadcast %cst_2 : f32 to vector<1x32xf32>
    %12 = vector.broadcast %cst_3 : f32 to vector<1x32xf32>
    %13 = arith.select %3, %11, %12 : vector<1x32xi1>, vector<1x32xf32>
    %14 = vector.broadcast %0 : vector<8x1xf32> to vector<8x32xf32>
    %15 = vector.broadcast %10 : vector<1x32xf32> to vector<8x32xf32>
    %16 = arith.mulf %14, %15 : vector<8x32xf32>
    %17 = vector.broadcast %13 : vector<1x32xf32> to vector<8x32xf32>
    %18 = arith.addf %16, %17 : vector<8x32xf32>
    %19 = math.sin %18 : vector<8x32xf32>
    %c0_4 = arith.constant 0 : index
    %c0_5 = arith.constant 0 : index
    %20 = vector.load %arg2[%c0_4, %c0_5] : memref<8x32xf32, #tpu.memory_space<vmem>>, vector<8x32xf32>
    tpu.vector_store %arg2[%c0_4, %c0_5], %19 {strides = array<i32>} : memref<8x32xf32, #tpu.memory_space<vmem>>, vector<8x32xf32>,
    return
  }
  func.func @transform_0(%arg0: i32) -> (i32, i32) {
    %c0_i32 = arith.constant 0 : i32
    %c0_i32_0 = arith.constant 0 : i32
    return %arg0, %c0_i32 : i32, i32
  }
  func.func @transform_1(%arg0: i32) -> (i32, i32) {
    %c0_i32 = arith.constant 0 : i32
    %c0_i32_0 = arith.constant 0 : i32
    return %arg0, %c0_i32 : i32, i32
  }
}

</mosaic_0001>

<bundles_post_ra>
// kernel: tpu_custom_call.1
= control target key start
LH: loop header
LB: loop body
LE: loop exit
PB: predicated region body
PF: predicated region fallthrough
CT: control target
= control target key end

     0   :  { %v200_v1 = vmov 0   ;;  %s257_s0 = inlined_call_operand.vmem [shape: f32[2,1], index: 0, kind: input, shape index: {}]   ;;  %s258_s1 = inlined_call_operand.hbm [shape: f32[2,32], index: 1, kind: output, shape index: {}]  }
   0x1   :  { %v9_v0 = vld [vmem:[%s257_s0] sm:$0xff]  ;;  %169 = vset.pattern.permute.xlu0 %v200_v1 }
   0x2   :  { %22 = vperm.xlu0 %169, %v9_v0  }
   0x3   :  { %6 = vsyncpa [#allocation3], 0  ;;  %v10_v2 = vlaneseq  ;;  %v201_v10 = vmov 1.5707964   ;;  %v202_v25 = vmov 683565275  }
   0x4   :  { %v203_v27 = vmov 2475754826   ;;  %v204_v30 = vmov 2131351028   ;;  %v205_v33 = vmov 2102212464  }
   0x5   :  { %v11_v3 = vand.u32 127, %v10_v2  ;;  %v206_v36 = vmov 920167782   ;;  %v207_v39 = vmov 1326507024   ;;  %vm131_vm12 = vcmask 261120  }
   0x7   :  { %v149_v4 = vadd.s32 4294967280, %v11_v3  ;;  %vm12_vm0 = vcmp.lt.s32.totalorder %v11_v3, 16 }
   0x8   :  { %v19_v11 = vsel %vm12_vm0, 0.0, %v201_v10 }
   0x9   :  { %v14_v5 = vsel %vm12_vm0, %v11_v3, %v149_v4 }
   0xa   :  { %v15_v6 = vcvt.s32.f32 %v14_v5 }
   0xc   :  { %v16_v7 = vmul.f32 -0.6140227, %v15_v6 }
   0xe   :  { %v17_v8 = vmul.f32 1.442695, %v16_v7 }
  0x10   :  { %170 = vpow2.f32 %v17_v8 }
  0x1a   :  { %v171_v9 = vpop.eup %170 }
  0x81   :  { %v23_v12 = vpop.permute.xlu0 %22 }
  0x82   :  { %v25_v13 = vmul.f32 %v171_v9, %v23_v12 }
  0x84   :  { %v224_v14 = vadd.f32 %v25_v13, %v19_v11 }
  0x86   :  { %v30_v15 = vand.u32 2139095040, %v224_v14  ;;  %v27_v19 = vand.u32 2147483647, %v224_v14  ;;  %vm29_vm8 = vcmp.lt.s32.totalorder %v224_v14, 0  ;;  %vm119_vm14 = vweird.f32 %v224_v14 }
  0x88   :  { %v31_v16 = vshrl.u32 %v30_v15, 23  ;;  %v34_v22 = vand.u32 8388607, %v27_v19  ;;  %vm28_vm9 = vcmp.le.f32.partialorder %v27_v19, 0.7853982 }
  0x8a   :  { %v150_v17 = vadd.s32 4294967169, %v31_v16  ;;  %v35_v41 = vor.u32 8388608, %v34_v22 }
  0x8c   :  { %v37_v18 = vadd.s32 1, %v150_v17  ;;  %v75_v55 = vshll.u32 %v35_v41, 8 }
  0x8e   :  { %vm38_vm1 = vcmp.gt.s32.totalorder %v37_v18, 0 }
  0x8f   :  { %v39_v20 = vsel %vm38_vm1, %v37_v18, 0 }
  0x90   :  { %v41_v21 = vand.u32 31, %v39_v20  ;;  %v40_v24 = vshrl.u32 %v39_v20, 5 }
  0x92   :  { %v42_v23 = vsub.s32 32, %v41_v21  ;;  %v44_v26 = vshll.u32 %v202_v25, %v41_v21  ;;  %v47_v28 = vshll.u32 %v203_v27, %v41_v21  ;;  %v50_v32 = vshll.u32 %v204_v30, %v41_v21 }
  0x93   :  { %v53_v35 = vshll.u32 %v205_v33, %v41_v21  ;;  %v56_v38 = vshll.u32 %v206_v36, %v41_v21  ;;  %vm59_vm2 = vcmp.lt.s32.totalorder %v40_v24, 1  ;;  %vm62_vm3 = vcmp.lt.s32.totalorder %v40_v24, 4 }
  0x94   :  { %v45_v29 = vshrl.u32 %v203_v27, %v42_v23  ;;  %v48_v31 = vshrl.u32 %v204_v30, %v42_v23  ;;  %v51_v34 = vshrl.u32 %v205_v33, %v42_v23  ;;  %v54_v37 = vshrl.u32 %v206_v36, %v42_v23 }
  0x95   :  { %v57_v40 = vshrl.u32 %v207_v39, %v42_v23  ;;  %v43_v50 = vshrl.u32 %v202_v25, %v42_v23  ;;  %vm61_vm4 = vcmp.lt.s32.totalorder %v40_v24, 3  ;;  %vm60_vm5 = vcmp.lt.s32.totalorder %v40_v24, 2 }
  0x96   :  { %v46_v42 = vor.u32 %v45_v29, %v44_v26  ;;  %v49_v43 = vor.u32 %v48_v31, %v47_v28  ;;  %v52_v44 = vor.u32 %v51_v34, %v50_v32  ;;  %v55_v45 = vor.u32 %v54_v37, %v53_v35 }
  0x97   :  { %v58_v46 = vor.u32 %v57_v40, %v56_v38 }
  0x98   :  { %v64_v47 = vsel %vm62_vm3, %v52_v44, 2102212464  ;;  %v67_v48 = vsel %vm59_vm2, %v46_v42, %v49_v43  ;;  %v71_v49 = vsel %vm59_vm2, %v49_v43, %v52_v44  ;;  %v68_v51 = vsel %vm62_vm3, %v55_v45, 920167782 }
  0x99   :  { %v72_v52 = vsel %vm62_vm3, %v58_v46, 1326507024  ;;  %v69_v53 = vsel %vm61_vm4, %v52_v44, %v68_v51  ;;  %v63_v56 = vsel %vm59_vm2, %v43_v50, %v46_v42  ;;  %v65_v57 = vsel %vm61_vm4, %v49_v43, %v64_v47 }
  0x9a   :  { %v73_v54 = vsel %vm61_vm4, %v55_v45, %v72_v52  ;;  %v70_v58 = vsel %vm60_vm5, %v67_v48, %v69_v53  ;;  %v66_v0 = vsel %vm60_vm5, %v63_v56, %v65_v57 }
  0x9b   :  { %v74_v59 = vsel %vm60_vm5, %v71_v49, %v73_v54  ;;  %v233_v62 = vmul.u32.u64.low %v75_v55, %v70_v58  ;;  %v234_v63 = vmul.u32.u64.high %v75_v55, %v70_v58, %v233_v62  ;;  %v82_v2 = vmul.u32 %v75_v55, %v66_v0 }
  0x9c   :  { %v230_v60 = vmul.u32.u64.low %v75_v55, %v74_v59  ;;  %v231_v61 = vmul.u32.u64.high %v75_v55, %v74_v59, %v230_v60 }
  0x9d   :  { %v85_v1 = vadd.s32 1, %v234_v63 }
  0x9e   :  { %vm84_vm6 = vc.u32 %v231_v61, %v233_v62  ;;  %v83_v15 = vadd.s32 %v233_v62, %v231_v61 }
  0x9f   :  { %v86_v3 = vsel %vm84_vm6, %v85_v1, %v234_v63 }
  0xa0   :  { %v87_v4 = vadd.s32 %v86_v3, %v82_v2 }
  0xa2   :  { %v88_v5 = vadd.s32 536870912, %v87_v4 }
  0xa4   :  { %v89_v6 = vshrl.u32 %v88_v5, 30 }
  0xa6   :  { %v90_v7 = vshll.u32 %v89_v6, 30  ;;  %v113_v28 = vsub.s32 4, %v89_v6 }
  0xa8   :  { %v91_v8 = vsub.s32 %v87_v4, %v90_v7  ;;  %v114_v31 = vsel %vm29_vm8, %v113_v28, %v89_v6 }
  0xa9   :  { %v116_v33 = vsel %vm28_vm9, 0, %v114_v31 }
  0xaa   :  { %v93_v9 = vsub.s32 0, %v91_v8  ;;  %v120_v34 = vadd.s32 3, %v116_v33 }
  0xac   :  { %v151_v10 = vmin.u32 %v93_v9, %v91_v8  ;;  %v121_v35 = vand.u32 3, %v120_v34 }
  0xae   :  { %v95_v11 = vclz %v151_v10  ;;  %vm126_vm10 = vcmp.eq.s32.totalorder %v121_v35, 2  ;;  %vm123_vm11 = vcmp.eq.s32.totalorder %v121_v35, 0  ;;  %vm122_vm13 = vcmp.lt.s32.totalorder %v121_v35, 2 }
  0xb0   :  { %v152_v12 = vadd.s32 4294967294, %v95_v11 }
  0xb2   :  { %vm153_vm7 = vcmp.lt.s32.totalorder %v152_v12, 0 }
  0xb3   :  { %v98_v13 = vsel %vm153_vm7, 0, %v152_v12 }
  0xb4   :  { %v99_v16 = vsub.s32 32, %v98_v13  ;;  %v103_v17 = vsub.s32 4294967266, %v98_v13  ;;  %v100_v18 = vshll.u32 %v91_v8, %v98_v13 }
  0xb6   :  { %v101_v20 = vshrl.u32 %v83_v15, %v99_v16  ;;  %v104_v21 = vadd.s32 127, %v103_v17 }
  0xb8   :  { %v102_v22 = vor.u32 %v101_v20, %v100_v18  ;;  %v105_v23 = vshll.u32 %v104_v21, 23 }
  0xba   :  { %v106_v24 = vor.u32 4788187, %v105_v23  ;;  %v109_v26 = vcvt.s32.f32 %v102_v22 }
  0xbc   :  { %v107_v25 = vand.u32 2147483647, %v106_v24 }
  0xbe   :  { %v110_v27 = vmul.f32 %v109_v26, %v107_v25 }
  0xc0   :  { %v111_v29 = vxor.u32 2147483648, %v110_v27 }
  0xc2   :  { %v112_v30 = vsel %vm29_vm8, %v111_v29, %v110_v27 }
  0xc3   :  { %v115_v32 = vsel %vm28_vm9, %v224_v14, %v112_v30 }
  0xc4   :  { %172 = vcosq.f32 %v115_v32 }
  0xc5   :  { %174 = vsinq.f32 %v115_v32 }
  0xce   :  { %v173_v36 = vpop.eup %172 }
  0xcf   :  { %v175_v37 = vpop.eup %174  ;;  %v127_v38 = vxor.u32 2147483648, %v173_v36 }
  0xd0   :  { %v124_v39 = vxor.u32 2147483648, %v175_v37 }
  0xd1   :  { %v128_v40 = vsel %vm126_vm10, %v127_v38, %v175_v37 }
  0xd2   :  { %v125_v41 = vsel %vm123_vm11, %v173_v36, %v124_v39 }
  0xd3   :  { %v129_v19 = vsel %vm122_vm13, %v125_v41, %v128_v40 }
  0xd4   :  { %v130_v42 = vsel %vm119_vm14, nan, %v129_v19 }
  0xd5   :  { %132 = vst.msk [vmem:[#allocation2] sm:$0xff] %vm131_vm12, %v130_v42 }
  0xd6   :  { %137 = vsyncadd [#allocation3], 96  ;;  %s208_s0 = smov [#allocation2]  }
  0xd7   :  { %s138_s8 = sshll.u32 %s208_s0, 4  ;;  %s139_s8 = int_to_ptr.vmem [resolvable:$true] %s138_s8 }
  0xd8   :  { %s176_s9 = scalar_lea.vmem %s139_s8, 32  ;;  %s180_s10 = scalar_lea.vmem %s139_s8, 128 }
  0xd9   :  { %p177_p0 = scmp.ne.s32.totalorder %s139_s8, %s176_s9  ;;  %p181_p1 = scmp.lt.s32.totalorder %s139_s8, %s139_s8 }
  0xda   :  { %p182_p2 = scmp.lt.s32.totalorder %s180_s10, %s176_s9 }
  0xdc   :  { %p183_p3 = por %p182_p2, %p181_p1 }
  0xde   :  { %p184_p4 = pnand %p183_p3, %p177_p0 }
  0xe0   :  { %187 = shalt.err (!%p184_p4)
}
  0xe1   :  { %s188_s13 = scalar_lea.hbm %s258_s1, 32 }
  0xe2   :  { %p189_p5 = scmp.ne.s32.totalorder %s258_s1, %s188_s13  ;;  %p192_p6 = scmp.lt.u32.totalorder %s188_s13, %s258_s1 }
  0xe4   :  { %p194_p7 = pnand %p192_p6, %p189_p5 }
  0xe6   :  { %197 = shalt.err (!%p194_p7)
}
  0xe7   :  { %s209_s18 = smov 32   ;;  %s210_s19 = smov 2  }
  0xe8   :  { %144 = dma.vmem_to_hbm [thread:$0]  %s139_s8, 32, %s258_s1, [#allocation3], %s209_s18, %s209_s18, %s210_s19  }
  0xe9   :  { %198 = dma.done.wait [#allocation3], 128  }
  0xea   :  { %199 = vsyncadd [#allocation3], 4294967168 }
  0xeb   :  { %148 = vsyncpa [#allocation3], 1 }

</bundles_post_ra>
